<compile_context>
chip_gen: v5e
topology: v5e:2x2
jax: 0.10.0
libtpu: 0.0.40
codegen_flags: <defaults>
</compile_context>

<pallas_src>
import jax
import jax.numpy as jnp
from jax import lax
from jax.experimental import pallas as pl
from jax.experimental.pallas import tpu as pltpu

LANES = 128
SUBLANES = 8
NCORES = 2            # leading "parallel" grid axis; harmless on 1-TC chips
CHUNK = 256           # rows per inner unrolled step (bounds live temporaries)
TM_MAX_2STREAM = 8192  # 2 streams x 2 bufs x 4 MiB = 16 MiB of VMEM (f32)
TM_MAX_3STREAM = 4096  # 3 streams x 2 bufs x 2 MiB = 12 MiB of VMEM (f32)
VMEM_LIMIT_BYTES = 32 * 1024 * 1024


def _round_up(x, m):
    return ((x + m - 1) // m) * m


def _make_kernel(*, streamed_thr, tm, chunk, steps, num_blocks, total, needs_mask):
    """Build the kernel closure (all tiling params are static Python ints)."""
    n_chunks = tm // chunk
    full_rows = total // LANES      # fully-valid rows of the logical 2-D layout
    rem = total % LANES             # valid lanes in the partially-valid row

    def kernel(yp_ref, yt_ref, thr_ref, tp_ref, pos_ref):
        c = pl.program_id(0)
        j = pl.program_id(1)
        blk = c * steps + j          # global row-block index

        @pl.when(j == 0)
        def _():
            tp_ref[...] = jnp.zeros_like(tp_ref)
            pos_ref[...] = jnp.zeros_like(pos_ref)

        if not streamed_thr:
            thr_scalar = thr_ref[0]              # f32 scalar from SMEM

        def process(mask_tail):
            def body(ci, carry):
                r0 = pl.multiple_of(ci * chunk, chunk)
                yp = yp_ref[pl.ds(r0, chunk), :].astype(jnp.float32)
                yt = yt_ref[pl.ds(r0, chunk), :].astype(jnp.float32)
                if streamed_thr:
                    thr = thr_ref[pl.ds(r0, chunk), :].astype(jnp.float32)
                else:
                    thr = thr_scalar

                true_pos = yt >= thr
                if mask_tail:
                    grow = (blk * tm + r0 +
                            lax.broadcasted_iota(jnp.int32, (chunk, LANES), 0))
                    valid = grow < full_rows
                    if rem:
                        lane = lax.broadcasted_iota(jnp.int32, (chunk, LANES), 1)
                        valid = valid | ((grow == full_rows) & (lane < rem))
                    true_pos = true_pos & valid

                pos_f = true_pos.astype(jnp.float32)
                tp_f = jnp.where(yp >= thr, pos_f, 0.0)   # folds one convert

                # Partial-reduce only across vreg groups (pure VPU adds); the
                # full cross-lane reduction happens once, in JAX.
                tp_ref[...] += jnp.sum(
                    tp_f.reshape(chunk // SUBLANES, SUBLANES, LANES),
                    axis=0, keepdims=True)
                pos_ref[...] += jnp.sum(
                    pos_f.reshape(chunk // SUBLANES, SUBLANES, LANES),
                    axis=0, keepdims=True)
                return carry

            if n_chunks == 1:
                body(0, 0)
            else:
                lax.fori_loop(0, n_chunks, body, 0, unroll=True)

        if not needs_mask:
            process(False)                  # exact fit: zero masking overhead
        elif num_blocks == 1:
            process(True)
        else:
            @pl.when(blk < num_blocks - 1)
            def _():
                process(False)

            @pl.when(blk == num_blocks - 1)
            def _():
                process(True)

    return kernel


def cmal_recall(y_pred, y_true, thresholds, *, _tm_max=None):
    """recall = mean(tp) / (mean(tp) + mean(fn) + 1e-8) over all elements."""
    y_pred = jnp.asarray(y_pred)
    y_true = jnp.asarray(y_true)
    thr = jnp.asarray(thresholds)
    if not jnp.issubdtype(y_pred.dtype, jnp.floating):
        y_pred = y_pred.astype(jnp.float32)
    if not jnp.issubdtype(y_true.dtype, jnp.floating):
        y_true = y_true.astype(jnp.float32)
    if not jnp.issubdtype(thr.dtype, jnp.floating):
        thr = thr.astype(jnp.float32)

    # Match PyTorch broadcasting between yPred / yTrue / thresholds.
    shape = jnp.broadcast_shapes(y_pred.shape, y_true.shape, thr.shape)
    if y_pred.shape != shape:
        y_pred = jnp.broadcast_to(y_pred, shape)
    if y_true.shape != shape:
        y_true = jnp.broadcast_to(y_true, shape)
    total = int(y_pred.size)

    scalar_thr = thr.size == 1
    streams = [y_pred.reshape(-1), y_true.reshape(-1)]
    if scalar_thr:
        thr_arg = thr.reshape(1).astype(jnp.float32)         # SMEM scalar
    else:
        # Stream the (broadcast) threshold; keeps x >= t exact (incl. inf).
        if thr.shape != shape:
            thr = jnp.broadcast_to(thr, shape)
        streams.append(thr.reshape(-1))

    # Pad only when the total is not lane-aligned (< 128 extra elements);
    # padded elements are masked out in-kernel so pad values are irrelevant.
    rem_total = total % LANES
    padded = total if rem_total == 0 else total + (LANES - rem_total)
    if padded != total:
        streams = [jnp.pad(s, (0, padded - total)) for s in streams]
    rows_p = padded // LANES
    arrs = [s.reshape(rows_p, LANES) for s in streams]

    tm_max = _tm_max if _tm_max is not None else (
        TM_MAX_2STREAM if scalar_thr else TM_MAX_3STREAM)
    if rows_p >= CHUNK:
        tm = min(_round_up(rows_p, CHUNK), _round_up(max(tm_max, CHUNK), CHUNK))
        chunk = CHUNK
    else:
        tm = _round_up(rows_p, SUBLANES)
        chunk = tm

    num_blocks = -(-rows_p // tm)
    if num_blocks % NCORES == 0:
        ncores_eff, steps = NCORES, num_blocks // NCORES
    else:
        ncores_eff, steps = 1, num_blocks       # keep every block index in range

    needs_mask = (num_blocks * tm * LANES != total)

    kernel = _make_kernel(streamed_thr=not scalar_thr, tm=tm, chunk=chunk,
                          steps=steps, num_blocks=num_blocks, total=total,
                          needs_mask=needs_mask)

    row_block = lambda c, j: (c * steps + j, 0)
    stream_spec = pl.BlockSpec((tm, LANES), row_block)
    if scalar_thr:
        in_specs = [stream_spec, stream_spec,
                    pl.BlockSpec(memory_space=pltpu.MemorySpace.SMEM)]
        inputs = (arrs[0], arrs[1], thr_arg)
    else:
        in_specs = [stream_spec, stream_spec, stream_spec]
        inputs = (arrs[0], arrs[1], arrs[2])

    out_bytes = 2 * ncores_eff * SUBLANES * LANES * 4
    cost = pl.CostEstimate(
        flops=6 * padded,
        transcendentals=0,
        bytes_accessed=sum(int(a.size) * a.dtype.itemsize for a in arrs) + out_bytes)

    tp_part, pos_part = pl.pallas_call(
        kernel,
        out_shape=(
            jax.ShapeDtypeStruct((ncores_eff, SUBLANES, LANES), jnp.float32),
            jax.ShapeDtypeStruct((ncores_eff, SUBLANES, LANES), jnp.float32),
        ),
        grid=(ncores_eff, steps),
        in_specs=in_specs,
        out_specs=(
            pl.BlockSpec((1, SUBLANES, LANES), lambda c, j: (c, 0, 0)),
            pl.BlockSpec((1, SUBLANES, LANES), lambda c, j: (c, 0, 0)),
        ),
        compiler_params=pltpu.CompilerParams(
            dimension_semantics=("parallel", "arbitrary"),
            vmem_limit_bytes=VMEM_LIMIT_BYTES,
        ),
        cost_estimate=cost,
    )(*inputs)

    # Tiny final combine; epsilon applied to the means, exactly as in PyTorch.
    inv_n = jnp.float32(1.0 / total)
    tp_mean = jnp.sum(tp_part) * inv_n
    pos_mean = jnp.sum(pos_part) * inv_n          # == tp_mean + fn_mean
    return tp_mean / (pos_mean + jnp.float32(1e-8))


def _reference(y_pred, y_true, thresholds):
    y_pred = jnp.asarray(y_pred, jnp.float32)
    y_true = jnp.asarray(y_true, jnp.float32)
    thr = jnp.broadcast_to(jnp.asarray(thresholds, jnp.float32), y_pred.shape)
    tp = jnp.mean((y_pred >= thr).astype(jnp.float32) *
                  (y_true >= thr).astype(jnp.float32))
    fn = jnp.mean((y_pred < thr).astype(jnp.float32) *
                  (y_true >= thr).astype(jnp.float32))
    return tp / (tp + fn + 1e-8)


if __name__ == "__main__":
    key = jax.random.PRNGKey(0)
    k1, k2, k3, k4, k5, k6 = jax.random.split(key, 6)

    # 1) NCHW inputs (batch=2, channels=4, spatial=16x16), scalar threshold 0.5
    yp = jax.random.uniform(k1, (2, 4, 16, 16), dtype=jnp.float32)
    yt = jax.random.uniform(k2, (2, 4, 16, 16), dtype=jnp.float32)
    out = jax.block_until_ready(cmal_recall(yp, yt, jnp.float32(0.5)))
    ref = _reference(yp, yt, jnp.float32(0.5))
    assert jnp.allclose(out, ref, atol=1e-6, rtol=1e-6), (out, ref)

    # 2) Awkward shape: exercises minimal lane padding + in-kernel tail masking
    yp_b = jax.random.uniform(k3, (3, 5, 7, 9), dtype=jnp.float32)
    yt_b = jax.random.uniform(k4, (3, 5, 7, 9), dtype=jnp.float32)
    out_b = jax.block_until_ready(cmal_recall(yp_b, yt_b, jnp.float32(0.3)))
    ref_b = _reference(yp_b, yt_b, jnp.float32(0.3))
    assert jnp.allclose(out_b, ref_b, atol=1e-6, rtol=1e-6), (out_b, ref_b)

    # 3) Per-channel thresholds: exercises the streamed-threshold path
    thr_c = jnp.array([0.2, 0.4, 0.6, 0.8], jnp.float32).reshape(1, 4, 1, 1)
    out_c = jax.block_until_ready(cmal_recall(yp, yt, thr_c))
    ref_c = _reference(yp, yt, thr_c)
    assert jnp.allclose(out_c, ref_c, atol=1e-6, rtol=1e-6), (out_c, ref_c)

    # 4) Multi-block grid with 2-core split and per-step accumulation
    #    (small tile override keeps the test input small).
    yp_m = jax.random.uniform(k5, (4, 4, 64, 128), dtype=jnp.float32)
    yt_m = jax.random.uniform(k6, (4, 4, 64, 128), dtype=jnp.float32)
    out_m = jax.block_until_ready(cmal_recall(yp_m, yt_m, jnp.float32(0.5), _tm_max=256))
    ref_m = _reference(yp_m, yt_m, jnp.float32(0.5))
    assert jnp.allclose(out_m, ref_m, atol=1e-6, rtol=1e-6), (out_m, ref_m)

    # 5) bf16 inputs streamed natively (half the HBM bytes), compared in f32
    out_h = jax.block_until_ready(
        cmal_recall(yp.astype(jnp.bfloat16), yt.astype(jnp.bfloat16), jnp.float32(0.5)))
    ref_h = _reference(yp.astype(jnp.bfloat16), yt.astype(jnp.bfloat16), jnp.float32(0.5))
    assert jnp.allclose(out_h, ref_h, atol=1e-6, rtol=1e-6), (out_h, ref_h)

    print("KERNEL_OK")
</pallas_src>

<mosaic_0001>
module attributes {stable_mosaic.version = 11 : i64} {
  func.func @kernel(%arg0: i32, %arg1: i32, %arg2: memref<16x128xf32, #tpu.memory_space<vmem>>, %arg3: memref<16x128xf32, #tpu.memory_space<vmem>>, %arg4: memref<1xf32, #tpu.memory_space<smem>>, %arg5: memref<1x8x128xf32, #tpu.memory_space<vmem>>, %arg6: memref<1x8x128xf32, #tpu.memory_space<vmem>>) attributes {dimension_semantics = [#tpu.dimension_semantics<parallel>, #tpu.dimension_semantics<arbitrary>], iteration_bounds = array<i64: 1, 1>, scalar_prefetch = 0 : i64, scratch_operands = 0 : i64, tpu.core_type = #tpu.core_type<tc>, window_params = [{transform_indices = @transform_0, window_bounds = array<i64: 16, 128>}, {transform_indices = @transform_1, window_bounds = array<i64: 16, 128>}, {transform_indices = @transform_2, window_bounds = array<i64: 1>}, {transform_indices = @transform_3, window_bounds = array<i64: 1, 8, 128>}, {transform_indices = @transform_4, window_bounds = array<i64: 1, 8, 128>}]} {
    %c0_i32 = arith.constant 0 : i32
    %0 = arith.cmpi eq, %arg1, %c0_i32 : i32
    %1 = arith.extui %0 : i1 to i32
    %c0_i32_0 = arith.constant 0 : i32
    %2 = arith.cmpi ne, %1, %c0_i32_0 : i32
    scf.if %2 {
      %cst_18 = arith.constant 0.000000e+00 : f32
      %29 = vector.broadcast %cst_18 : f32 to vector<1x8x128xf32>
      %c0_19 = arith.constant 0 : index
      %c0_20 = arith.constant 0 : index
      %c0_21 = arith.constant 0 : index
      %30 = vector.load %arg5[%c0_19, %c0_20, %c0_21] : memref<1x8x128xf32, #tpu.memory_space<vmem>>, vector<1x8x128xf32>
      tpu.vector_store %arg5[%c0_19, %c0_20, %c0_21], %29 {strides = array<i32>} : memref<1x8x128xf32, #tpu.memory_space<vmem>>, vector<1x8x128xf32>,
      %cst_22 = arith.constant 0.000000e+00 : f32
      %31 = vector.broadcast %cst_22 : f32 to vector<1x8x128xf32>
      %c0_23 = arith.constant 0 : index
      %c0_24 = arith.constant 0 : index
      %c0_25 = arith.constant 0 : index
      %32 = vector.load %arg6[%c0_23, %c0_24, %c0_25] : memref<1x8x128xf32, #tpu.memory_space<vmem>>, vector<1x8x128xf32>
      tpu.vector_store %arg6[%c0_23, %c0_24, %c0_25], %31 {strides = array<i32>} : memref<1x8x128xf32, #tpu.memory_space<vmem>>, vector<1x8x128xf32>,
    } else {
    }
    %c0 = arith.constant 0 : index
    %3 = memref.load %arg4[%c0] : memref<1xf32, #tpu.memory_space<smem>>
    %c0_i32_1 = arith.constant 0 : i32
    %4 = tpu.assume_multiple %c0_i32_1, 16 : i32
    %5 = arith.index_cast %4 : i32 to index
    %c0_2 = arith.constant 0 : index
    %6 = vector.load %arg2[%5, %c0_2] : memref<16x128xf32, #tpu.memory_space<vmem>>, vector<16x128xf32>
    %7 = arith.index_cast %4 : i32 to index
    %c0_3 = arith.constant 0 : index
    %8 = vector.load %arg3[%7, %c0_3] : memref<16x128xf32, #tpu.memory_space<vmem>>, vector<16x128xf32>
    %9 = vector.broadcast %3 : f32 to vector<16x128xf32>
    %10 = arith.cmpf oge, %8, %9 : vector<16x128xf32>
    %11 = arith.extui %10 : vector<16x128xi1> to vector<16x128xi32>
    %12 = arith.sitofp %11 : vector<16x128xi32> to vector<16x128xf32>
    %13 = vector.broadcast %3 : f32 to vector<16x128xf32>
    %14 = arith.cmpf oge, %6, %13 : vector<16x128xf32>
    %cst = arith.constant 0.000000e+00 : f32
    %15 = vector.broadcast %cst : f32 to vector<16x128xf32>
    %16 = arith.select %14, %12, %15 : vector<16x128xi1>, vector<16x128xf32>
    %c0_4 = arith.constant 0 : index
    %c0_5 = arith.constant 0 : index
    %c0_6 = arith.constant 0 : index
    %17 = vector.load %arg5[%c0_4, %c0_5, %c0_6] : memref<1x8x128xf32, #tpu.memory_space<vmem>>, vector<1x8x128xf32>
    %18 = vector.shape_cast %16 : vector<16x128xf32> to vector<2x8x128xf32>
    %cst_7 = arith.constant dense<0.000000e+00> : vector<8x128xf32>
    %19 = vector.multi_reduction <add>, %18, %cst_7 [0] : vector<2x8x128xf32> to vector<8x128xf32>
    %20 = vector.shape_cast %19 : vector<8x128xf32> to vector<1x8x128xf32>
    %21 = arith.addf %17, %20 : vector<1x8x128xf32>
    %c0_8 = arith.constant 0 : index
    %c0_9 = arith.constant 0 : index
    %c0_10 = arith.constant 0 : index
    %22 = vector.load %arg5[%c0_8, %c0_9, %c0_10] : memref<1x8x128xf32, #tpu.memory_space<vmem>>, vector<1x8x128xf32>
    tpu.vector_store %arg5[%c0_8, %c0_9, %c0_10], %21 {strides = array<i32>} : memref<1x8x128xf32, #tpu.memory_space<vmem>>, vector<1x8x128xf32>,
    %c0_11 = arith.constant 0 : index
    %c0_12 = arith.constant 0 : index
    %c0_13 = arith.constant 0 : index
    %23 = vector.load %arg6[%c0_11, %c0_12, %c0_13] : memref<1x8x128xf32, #tpu.memory_space<vmem>>, vector<1x8x128xf32>
    %24 = vector.shape_cast %12 : vector<16x128xf32> to vector<2x8x128xf32>
    %cst_14 = arith.constant dense<0.000000e+00> : vector<8x128xf32>
    %25 = vector.multi_reduction <add>, %24, %cst_14 [0] : vector<2x8x128xf32> to vector<8x128xf32>
    %26 = vector.shape_cast %25 : vector<8x128xf32> to vector<1x8x128xf32>
    %27 = arith.addf %23, %26 : vector<1x8x128xf32>
    %c0_15 = arith.constant 0 : index
    %c0_16 = arith.constant 0 : index
    %c0_17 = arith.constant 0 : index
    %28 = vector.load %arg6[%c0_15, %c0_16, %c0_17] : memref<1x8x128xf32, #tpu.memory_space<vmem>>, vector<1x8x128xf32>
    tpu.vector_store %arg6[%c0_15, %c0_16, %c0_17], %27 {strides = array<i32>} : memref<1x8x128xf32, #tpu.memory_space<vmem>>, vector<1x8x128xf32>,
    return
  }
  func.func @transform_0(%arg0: i32, %arg1: i32) -> (i32, i32) {
    %c1_i32 = arith.constant 1 : i32
    %0 = arith.muli %arg0, %c1_i32 : i32
    %1 = arith.addi %0, %arg1 : i32
    %c0_i32 = arith.constant 0 : i32
    %c0_i32_0 = arith.constant 0 : i32
    return %1, %c0_i32 : i32, i32
  }
  func.func @transform_1(%arg0: i32, %arg1: i32) -> (i32, i32) {
    %c1_i32 = arith.constant 1 : i32
    %0 = arith.muli %arg0, %c1_i32 : i32
    %1 = arith.addi %0, %arg1 : i32
    %c0_i32 = arith.constant 0 : i32
    %c0_i32_0 = arith.constant 0 : i32
    return %1, %c0_i32 : i32, i32
  }
  func.func @transform_2(%arg0: i32, %arg1: i32) -> i32 {
    %c0_i32 = arith.constant 0 : i32
    %c0_i32_0 = arith.constant 0 : i32
    return %c0_i32 : i32
  }
  func.func @transform_3(%arg0: i32, %arg1: i32) -> (i32, i32, i32) {
    %c0_i32 = arith.constant 0 : i32
    %c0_i32_0 = arith.constant 0 : i32
    %c0_i32_1 = arith.constant 0 : i32
    return %arg0, %c0_i32, %c0_i32_0 : i32, i32, i32
  }
  func.func @transform_4(%arg0: i32, %arg1: i32) -> (i32, i32, i32) {
    %c0_i32 = arith.constant 0 : i32
    %c0_i32_0 = arith.constant 0 : i32
    %c0_i32_1 = arith.constant 0 : i32
    return %arg0, %c0_i32, %c0_i32_0 : i32, i32, i32
  }
}

</mosaic_0001>

<bundles_post_ra>
// kernel: tpu_custom_call.1
= control target key start
LH: loop header
LB: loop body
LE: loop exit
PB: predicated region body
PF: predicated region fallthrough
CT: control target
= control target key end

     0   :  { %11 = vsyncpa [#allocation4], 0  ;;  %s287_s0 = inlined_call_operand.hbm [shape: f32[16,128], index: 0, kind: input, shape index: {}]   ;;  %s288_s1 = inlined_call_operand.hbm [shape: f32[16,128], index: 1, kind: input, shape index: {}]   ;;  %s289_s2 = inlined_call_operand.<no memory space> [shape: f32[1], index: 2, kind: input, shape index: {}]   ;;  %s290_s3 = inlined_call_operand.hbm [shape: f32[1,8,128], index: 3, kind: output, shape index: {0}]   ;;  %s291_s4 = inlined_call_operand.hbm [shape: f32[1,8,128], index: 4, kind: output, shape index: {1}]  }
   0x1   :  { %12 = vsyncpa [#allocation7], 0 }
   0x2   :  { %13 = vsyncpa [#allocation5], 0 }
   0x3   :  { %14 = vsyncpa [#allocation10], 0  ;;  %s23_s17 = sshll.u32 %s287_s0, 4  ;;  %s240_s18 = smov [#allocation3]   ;;  %s24_s17 = int_to_ptr.hbm [resolvable:$true] %s23_s17 }
   0x4   :  { %s25_s19 = sshll.u32 %s240_s18, 4  ;;  %s40_s22 = sshll.u32 %s288_s1, 4  ;;  %s26_s19 = int_to_ptr.vmem [resolvable:$true] %s25_s19  ;;  %s41_s22 = int_to_ptr.hbm [resolvable:$true] %s40_s22 }
   0x5   :  { %s241_s23 = smov 128   ;;  %s242_s24 = smov 8  }
   0x6   :  { %31 = dma.hbm_to_vmem [thread:$0]  %s24_s17, 256, %s26_s19, [#allocation4], %s241_s23, %s241_s23, %s242_s24  }
   0x7   :  { %s243_s25 = smov [#allocation6]  }
   0x8   :  { %s42_s26 = sshll.u32 %s243_s25, 4  ;;  %s43_s26 = int_to_ptr.vmem [resolvable:$true] %s42_s26 }
   0x9   :  { %48 = dma.hbm_to_vmem [thread:$0]  %s41_s22, 256, %s43_s26, [#allocation7], %s241_s23, %s241_s23, %s242_s24  }
   0xa   :  { %232 = dma.done.wait [#allocation4], 256  }
   0xb   :  { %233 = vsyncadd [#allocation4], 4294967040 }
   0xc   :  { %234 = dma.done.wait [#allocation7], 256  }
   0xd   :  { %235 = vsyncadd [#allocation7], 4294967040  ;;  %v74_v0 = vstv %s289_s2  ;;  %v72_v1 = vld [vmem:[#allocation6] sm:$0xff]  ;;  %v73_v2 = vld [vmem:[#allocation6 + $0x8] sm:$0xff]  ;;  %v244_v5 = vmov 0.0   ;;  %s245_s1 = smov [#allocation9]  }
   0xe   :  { %v70_v3 = vld [vmem:[#allocation3] sm:$0xff]  ;;  %vm75_vm0 = vcmp.ge.f32.partialorder %v72_v1, %v74_v0  ;;  %vm76_vm1 = vcmp.ge.f32.partialorder %v73_v2, %v74_v0  ;;  %v71_v4 = vld [vmem:[#allocation3 + $0x8] sm:$0xff]  ;;  %s109_s28 = sshll.u32 %s245_s1, 4  ;;  %s111_s5 = sshll.u32 %s291_s4, 4  ;;  %s110_s28 = int_to_ptr.vmem [resolvable:$true] %s109_s28  ;;  %s112_s5 = int_to_ptr.hbm [resolvable:$true] %s111_s5 }
   0xf   :  { %vm81_vm2 = vcmp.ge.f32.partialorder %v70_v3, %v74_v0  ;;  %v127_v6 = vsel %vm75_vm0, 1.0, %v244_v5  ;;  %v128_v7 = vsel %vm76_vm1, 1.0, %v244_v5  ;;  %vm82_vm3 = vcmp.ge.f32.partialorder %v71_v4, %v74_v0  ;;  %s246_s2 = smov [#allocation8]   ;;  %s100_s9 = sshll.u32 %s290_s3, 4  ;;  %s101_s9 = int_to_ptr.hbm [resolvable:$true] %s100_s9 }
  0x10   :  { %v83_v8 = vsel %vm81_vm2, %v127_v6, 0.0  ;;  %v84_v9 = vsel %vm82_vm3, %v128_v7, 0.0  ;;  %v90_v10 = vadd.f32 %v128_v7, %v127_v6  ;;  %s98_s6 = sshll.u32 %s246_s2, 4  ;;  %s99_s6 = int_to_ptr.vmem [resolvable:$true] %s98_s6 }
  0x11   :  { %v86_v11 = vadd.f32 %v84_v9, %v83_v8 }
  0x12   :  { %92 = vst [vmem:[#allocation9] sm:$0xff] %v90_v10 }
  0x13   :  { %88 = vst [vmem:[#allocation8] sm:$0xff] %v86_v11  ;;  %114 = dma.vmem_to_hbm [thread:$0]  %s110_s28, 128, %s112_s5, [#allocation10]  }
  0x14   :  { %103 = dma.vmem_to_hbm [thread:$0]  %s99_s6, 128, %s101_s9, [#allocation5]  }
  0x15   :  { %236 = dma.done.wait [#allocation5], 128  }
  0x16   :  { %237 = vsyncadd [#allocation5], 4294967168 }
  0x17   :  { %238 = dma.done.wait [#allocation10], 128  }
  0x18   :  { %239 = vsyncadd [#allocation10], 4294967168 }
  0x19   :  { %123 = vsyncpa [#allocation4], 1 }
  0x1a   :  { %124 = vsyncpa [#allocation7], 1 }
  0x1b   :  { %125 = vsyncpa [#allocation5], 1 }
  0x1c   :  { %126 = vsyncpa [#allocation10], 1 }

</bundles_post_ra>
